<compile_context>
chip_gen: v6e
topology: v6e:2x2x1
jax: 0.10.0
libtpu: 0.0.40
codegen_flags: <defaults>
</compile_context>

<pallas_src>
import functools

import jax
import jax.numpy as jnp
from jax.experimental import pallas as pl
from jax.experimental.pallas import tpu as pltpu


def coordconv_kernel(x_ref, coords_ref, o_ref, *, num_ch):
    """One (batch, spatial) tile: copy input channels, broadcast coord channels."""
    tile_b = o_ref.shape[0]
    tile_hw = o_ref.shape[-1]

    # Channels [0, C): straight copy of the input (lane-dense stores).
    o_ref[:, pl.ds(0, num_ch), :] = x_ref[...]

    # Channels [C, C+2): the (2, tile_hw) coordinate tile repeated over batch.
    coords = coords_ref[...]                                     # (2, tile_hw)
    o_ref[:, pl.ds(num_ch, 2), :] = jnp.broadcast_to(
        coords[None, :, :], (tile_b, 2, tile_hw)
    ).astype(o_ref.dtype)


def _pick_tile_hw(hw):
    """Largest lane-dense (multiple-of-128) divisor of hw that keeps tiles modest."""
    if hw <= 32768 or hw % 128 != 0:
        return hw
    for cand in (32768, 16384, 8192, 4096, 2048, 1024, 512, 256, 128):
        if hw % cand == 0:
            return cand
    return hw


@functools.partial(jax.jit, static_argnames=("tile_b", "tile_hw"))
def coordconv_forward(x, coords, *, tile_b=None, tile_hw=None):
    """x: (B, C, H, W); coords: (2, H, W) -> (B, C+2, H, W)."""
    B, C, H, W = x.shape
    HW = H * W
    if tile_b is None:
        tile_b = B                     # collapse batch grid for small problems
    if tile_hw is None:
        tile_hw = _pick_tile_hw(HW)    # full extent unless the map is large
    assert B % tile_b == 0, "B must be divisible by tile_b"
    assert HW % tile_hw == 0, "H*W must be divisible by tile_hw"

    x_flat = x.reshape(B, C, HW)
    coords_flat = coords.reshape(2, HW).astype(x.dtype)

    grid = (B // tile_b, HW // tile_hw)
    itemsize = jnp.dtype(x.dtype).itemsize
    bytes_accessed = (
        B * C * HW * itemsize                        # read x
        + grid[0] * 2 * HW * itemsize                # read coords (per batch tile)
        + B * (C + 2) * HW * itemsize                # write out
    )

    out_flat = pl.pallas_call(
        functools.partial(coordconv_kernel, num_ch=C),
        out_shape=jax.ShapeDtypeStruct((B, C + 2, HW), x.dtype),
        grid=grid,
        in_specs=[
            # x tile: batch and flattened-spatial tiled, channels resident.
            pl.BlockSpec((tile_b, C, tile_hw), lambda i, j: (i, 0, j)),
            # coordinate buffer: tiny, spatial-tiled, batch-invariant.
            pl.BlockSpec((2, tile_hw), lambda i, j: (0, j)),
        ],
        out_specs=pl.BlockSpec((tile_b, C + 2, tile_hw), lambda i, j: (i, 0, j)),
        compiler_params=pltpu.CompilerParams(
            dimension_semantics=(
                "parallel" if grid[0] > 1 else "arbitrary",
                "parallel" if grid[1] > 1 else "arbitrary",
            ),
        ),
        cost_estimate=pl.CostEstimate(
            flops=0, transcendentals=0, bytes_accessed=bytes_accessed
        ),
    )(x_flat, coords_flat)

    return out_flat.reshape(B, C + 2, H, W)


def make_coords(h, w, dtype=jnp.float32):
    """Same buffer CoordConv.__init__ registers: (2, h, w), channels = [x_grid, y_grid]."""
    xs = jnp.linspace(-1.0, 1.0, w, dtype=dtype)
    ys = jnp.linspace(-1.0, 1.0, h, dtype=dtype)
    y_grid, x_grid = jnp.meshgrid(ys, xs, indexing="ij")   # torch.meshgrid default
    return jnp.stack([x_grid, y_grid], axis=0)             # (2, h, w)


def reference_forward(x, coords):
    """Pure-JAX replica of CoordConv.forward."""
    B = x.shape[0]
    repeated = jnp.broadcast_to(coords[None], (B,) + coords.shape).astype(x.dtype)
    return jnp.concatenate([x, repeated], axis=1)


if __name__ == "__main__":
    # Small shapes consistent with the module: image-like feature map + 2 coord channels.
    batch, channels, height, width = 2, 4, 16, 16

    key = jax.random.PRNGKey(0)
    x = jax.random.normal(key, (batch, channels, height, width), dtype=jnp.float32)
    coords = make_coords(height, width)

    out = coordconv_forward(x, coords)          # single grid step for this size
    out = jax.block_until_ready(out)

    ref = reference_forward(x, coords)
    assert out.shape == (batch, channels + 2, height, width)
    assert jnp.allclose(out, ref, atol=0.0, rtol=0.0), "mismatch vs reference"

    print("KERNEL_OK")
</pallas_src>

<mosaic_0001>
module attributes {stable_mosaic.version = 11 : i64} {
  func.func @coordconv_kernel(%arg0: i32, %arg1: i32, %arg2: memref<2x4x256xf32, #tpu.memory_space<vmem>>, %arg3: memref<2x256xf32, #tpu.memory_space<vmem>>, %arg4: memref<2x6x256xf32, #tpu.memory_space<vmem>>) attributes {dimension_semantics = [#tpu.dimension_semantics<arbitrary>, #tpu.dimension_semantics<arbitrary>], iteration_bounds = array<i64: 1, 1>, scalar_prefetch = 0 : i64, scratch_operands = 0 : i64, tpu.core_type = #tpu.core_type<tc>, window_params = [{transform_indices = @transform_0, window_bounds = array<i64: 2, 4, 256>}, {transform_indices = @transform_1, window_bounds = array<i64: 2, 256>}, {transform_indices = @transform_2, window_bounds = array<i64: 2, 6, 256>}]} {
    %c0 = arith.constant 0 : index
    %c0_0 = arith.constant 0 : index
    %c0_1 = arith.constant 0 : index
    %0 = vector.load %arg2[%c0, %c0_0, %c0_1] : memref<2x4x256xf32, #tpu.memory_space<vmem>>, vector<2x4x256xf32>
    %c0_2 = arith.constant 0 : index
    %c0_3 = arith.constant 0 : index
    %c0_4 = arith.constant 0 : index
    %1 = vector.load %arg4[%c0_2, %c0_3, %c0_4] : memref<2x6x256xf32, #tpu.memory_space<vmem>>, vector<2x4x256xf32>
    tpu.vector_store %arg4[%c0_2, %c0_3, %c0_4], %0 {strides = array<i32>} : memref<2x6x256xf32, #tpu.memory_space<vmem>>, vector<2x4x256xf32>,
    %c0_5 = arith.constant 0 : index
    %c0_6 = arith.constant 0 : index
    %2 = vector.load %arg3[%c0_5, %c0_6] : memref<2x256xf32, #tpu.memory_space<vmem>>, vector<2x256xf32>
    %3 = vector.shape_cast %2 : vector<2x256xf32> to vector<1x2x256xf32>
    %4 = vector.shape_cast %3 : vector<1x2x256xf32> to vector<1x2x256xf32>
    %5 = vector.broadcast %4 : vector<1x2x256xf32> to vector<2x2x256xf32>
    %c0_7 = arith.constant 0 : index
    %c4 = arith.constant 4 : index
    %c0_8 = arith.constant 0 : index
    %6 = vector.load %arg4[%c0_7, %c4, %c0_8] : memref<2x6x256xf32, #tpu.memory_space<vmem>>, vector<2x2x256xf32>
    tpu.vector_store %arg4[%c0_7, %c4, %c0_8], %5 {strides = array<i32>} : memref<2x6x256xf32, #tpu.memory_space<vmem>>, vector<2x2x256xf32>,
    return
  }
  func.func @transform_0(%arg0: i32, %arg1: i32) -> (i32, i32, i32) {
    %c0_i32 = arith.constant 0 : i32
    %c0_i32_0 = arith.constant 0 : i32
    return %arg0, %c0_i32, %arg1 : i32, i32, i32
  }
  func.func @transform_1(%arg0: i32, %arg1: i32) -> (i32, i32) {
    %c0_i32 = arith.constant 0 : i32
    %c0_i32_0 = arith.constant 0 : i32
    return %c0_i32, %arg1 : i32, i32
  }
  func.func @transform_2(%arg0: i32, %arg1: i32) -> (i32, i32, i32) {
    %c0_i32 = arith.constant 0 : i32
    %c0_i32_0 = arith.constant 0 : i32
    return %arg0, %c0_i32, %arg1 : i32, i32, i32
  }
}

</mosaic_0001>

<bundles_post_ra>
// kernel: coordconv_forward.1
= control target key start
LH: loop header
LB: loop body
LE: loop exit
PB: predicated region body
PF: predicated region fallthrough
CT: control target
= control target key end

     0   :  { %s94_s0 = inlined_call_operand.vmem [shape: f32[2,4,256], index: 0, kind: input, shape index: {}]   ;;  %s95_s2 = inlined_call_operand.vmem [shape: f32[2,6,256], index: 2, kind: output, shape index: {}]   ;;  %s96_s1 = inlined_call_operand.vmem [shape: f32[2,256], index: 1, kind: input, shape index: {}]  }
   0x1   :  { %v11_v0 = vld [vmem:[%s94_s0] sm:$0xff]  ;;  %v12_v1 = vld [vmem:[%s94_s0 + $0x8] sm:$0xff] }
   0x2   :  { %v43_v2 = vld.sshfl [vmem:[%s96_s1] sm:$0x33 pattern:$0x76325410]  ;;  %19 = vst [vmem:[%s95_s2] sm:$0xf] %v11_v0  ;;  %v15_v3 = vcombine.high %v11_v0, %v11_v0  ;;  %v16_v4 = vcombine.high %v12_v1, %v12_v1 }
   0x3   :  { %21 = vst [vmem:[%s95_s2 + $0x10] sm:$0xf] %v12_v1  ;;  %v32_v5 = vcombine.low %v43_v2, %v43_v2  ;;  %36 = vst [vmem:[%s95_s2 + $0x8] sm:$0x30] %v43_v2 }
   0x4   :  { %38 = vst [vmem:[%s95_s2 + $0x18] sm:$0x30] %v43_v2  ;;  %20 = vst [vmem:[%s95_s2 + $0x8] sm:$0xf] %v15_v3 }
   0x5   :  { %22 = vst [vmem:[%s95_s2 + $0x18] sm:$0xf] %v16_v4  ;;  %35 = vst [vmem:[%s95_s2] sm:$0x30] %v32_v5 }
   0x6   :  { %37 = vst [vmem:[%s95_s2 + $0x10] sm:$0x30] %v32_v5 }

</bundles_post_ra>
